<compile_context>
chip_gen: v7x
topology: tpu7x:2x2x1
jax: 0.10.0
libtpu: 0.0.40
codegen_flags: <defaults>
</compile_context>

<pallas_src>
import functools

import jax
import jax.numpy as jnp
from jax.experimental import pallas as pl
from jax.experimental.pallas import tpu as pltpu

N_PAD = 128    # lane width
SUB_PAD = 8    # sublane width; holds up to 7 rows of A plus the b row


def quadratic_kernel(x_s, c_s, m_ref, o_ref, *, n):
    # x_s  : (n,)     f32 SMEM  -- evaluation point
    # c_s  : (1,)     f32 SMEM  -- constant offset
    # m_ref: (8, 128) f32 VMEM  -- rows 0..n-1 = 0.5*A (zero padded),
    #                              row n = b (zero padded), rest zero
    # o_ref: (1, 1)   f32 VMEM
    #
    # r_j = 0.5 * sum_i x_i A_ij + b_j  (row over lanes; unrolled VPU ops)
    r = m_ref[n:n + 1, :]                       # start from the b row
    for i in range(n):
        r = r + x_s[i] * m_ref[i:i + 1, :]

    # Lane vector [x_0, ..., x_{n-1}, 0, ...] built in-register from SMEM scalars
    # (no host-side padding of x needed).
    lane = jax.lax.broadcasted_iota(jnp.int32, (1, N_PAD), 1)
    xv = jnp.zeros((1, N_PAD), jnp.float32)
    for i in range(n):
        xv = jnp.where(lane == i, x_s[i], xv)

    # Single fused lane reduce, then the scalar c on top.
    o_ref[...] = jnp.sum(r * xv, axis=-1, keepdims=True) + c_s[0]


def make_quadratic(a, b, c):
    """Pads/folds parameters once; returns a jitted forward(x) -> (1,) callable."""
    a = jnp.asarray(a, jnp.float32)
    b = jnp.asarray(b, jnp.float32)
    n = a.shape[0]
    assert a.shape == (n, n) and b.shape == (n,) and n + 1 <= SUB_PAD

    # One-time parameter prep: 0.5*A folded in, b appended as an extra row.
    m_pad = jnp.zeros((SUB_PAD, N_PAD), jnp.float32)
    m_pad = m_pad.at[:n, :n].set(0.5 * a)
    m_pad = m_pad.at[n, :n].set(b)
    c_arr = jnp.asarray(c, jnp.float32).reshape(1)

    kernel_call = pl.pallas_call(
        functools.partial(quadratic_kernel, n=n),
        out_shape=jax.ShapeDtypeStruct((1, 1), jnp.float32),
        in_specs=[
            pl.BlockSpec(memory_space=pltpu.MemorySpace.SMEM),  # x scalars
            pl.BlockSpec(memory_space=pltpu.MemorySpace.SMEM),  # c scalar
            pl.BlockSpec(memory_space=pltpu.MemorySpace.VMEM),  # packed [0.5*A; b]
        ],
        out_specs=pl.BlockSpec(memory_space=pltpu.MemorySpace.VMEM),
    )

    @jax.jit
    def forward(x):
        out = kernel_call(x.astype(jnp.float32), c_arr, m_pad)
        return out.reshape(1)  # matches torch's broadcast result shape (1,)

    return forward


if __name__ == "__main__":
    input_size = 3
    key = jax.random.PRNGKey(0)
    k_a, k_b, k_c, k_x = jax.random.split(key, 4)

    # Deterministic synthetic parameters (same shapes as the torch module).
    a = jax.random.normal(k_a, (input_size, input_size), jnp.float32)
    b = jax.random.normal(k_b, (input_size,), jnp.float32)
    c = jax.random.normal(k_c, (), jnp.float32)
    x = jax.random.normal(k_x, (input_size,), jnp.float32)

    quadratic = make_quadratic(a, b, c)
    out = jax.block_until_ready(quadratic(x))

    # Pure-JAX reference for correctness (unsymmetrized A, as in the torch module).
    ref = 0.5 * jnp.dot(jnp.dot(x, a), x) + jnp.dot(b, x) + c
    assert out.shape == (1,)
    assert jnp.allclose(out[0], ref, atol=1e-4, rtol=1e-4), (out, ref)

    # TODO(synk): Quadratic.gradient() (autograd backward) is not part of the
    # forward pass and is not implemented here.
    print("KERNEL_OK")
</pallas_src>

<mosaic_0001>
module attributes {stable_mosaic.version = 11 : i64} {
  func.func @quadratic_kernel(%arg0: memref<3xf32, #tpu.memory_space<smem>>, %arg1: memref<1xf32, #tpu.memory_space<smem>>, %arg2: memref<8x128xf32, #tpu.memory_space<vmem>>, %arg3: memref<1x1xf32, #tpu.memory_space<vmem>>) attributes {dimension_semantics = [], scalar_prefetch = 0 : i64, scratch_operands = 0 : i64, tpu.core_type = #tpu.core_type<tc>} {
    %c3 = arith.constant 3 : index
    %c0 = arith.constant 0 : index
    %0 = vector.load %arg2[%c3, %c0] : memref<8x128xf32, #tpu.memory_space<vmem>>, vector<1x128xf32>
    %c0_0 = arith.constant 0 : index
    %1 = memref.load %arg0[%c0_0] : memref<3xf32, #tpu.memory_space<smem>>
    %c0_1 = arith.constant 0 : index
    %c0_2 = arith.constant 0 : index
    %2 = vector.load %arg2[%c0_1, %c0_2] : memref<8x128xf32, #tpu.memory_space<vmem>>, vector<1x128xf32>
    %3 = vector.broadcast %1 : f32 to vector<1x128xf32>
    %4 = arith.mulf %3, %2 : vector<1x128xf32>
    %5 = arith.addf %0, %4 : vector<1x128xf32>
    %c1 = arith.constant 1 : index
    %6 = memref.load %arg0[%c1] : memref<3xf32, #tpu.memory_space<smem>>
    %c1_3 = arith.constant 1 : index
    %c0_4 = arith.constant 0 : index
    %7 = vector.load %arg2[%c1_3, %c0_4] : memref<8x128xf32, #tpu.memory_space<vmem>>, vector<1x128xf32>
    %8 = vector.broadcast %6 : f32 to vector<1x128xf32>
    %9 = arith.mulf %8, %7 : vector<1x128xf32>
    %10 = arith.addf %5, %9 : vector<1x128xf32>
    %c2 = arith.constant 2 : index
    %11 = memref.load %arg0[%c2] : memref<3xf32, #tpu.memory_space<smem>>
    %c2_5 = arith.constant 2 : index
    %c0_6 = arith.constant 0 : index
    %12 = vector.load %arg2[%c2_5, %c0_6] : memref<8x128xf32, #tpu.memory_space<vmem>>, vector<1x128xf32>
    %13 = vector.broadcast %11 : f32 to vector<1x128xf32>
    %14 = arith.mulf %13, %12 : vector<1x128xf32>
    %15 = arith.addf %10, %14 : vector<1x128xf32>
    %16 = tpu.iota {dimensions = array<i32: 1>} : vector<1x128xi32>
    %cst = arith.constant 0.000000e+00 : f32
    %17 = vector.broadcast %cst : f32 to vector<1x128xf32>
    %c0_i32 = arith.constant 0 : i32
    %18 = vector.broadcast %c0_i32 : i32 to vector<1x128xi32>
    %19 = arith.cmpi eq, %16, %18 : vector<1x128xi32>
    %c0_7 = arith.constant 0 : index
    %20 = memref.load %arg0[%c0_7] : memref<3xf32, #tpu.memory_space<smem>>
    %21 = vector.broadcast %20 : f32 to vector<1x128xf32>
    %22 = arith.select %19, %21, %17 : vector<1x128xi1>, vector<1x128xf32>
    %c1_i32 = arith.constant 1 : i32
    %23 = vector.broadcast %c1_i32 : i32 to vector<1x128xi32>
    %24 = arith.cmpi eq, %16, %23 : vector<1x128xi32>
    %c1_8 = arith.constant 1 : index
    %25 = memref.load %arg0[%c1_8] : memref<3xf32, #tpu.memory_space<smem>>
    %26 = vector.broadcast %25 : f32 to vector<1x128xf32>
    %27 = arith.select %24, %26, %22 : vector<1x128xi1>, vector<1x128xf32>
    %c2_i32 = arith.constant 2 : i32
    %28 = vector.broadcast %c2_i32 : i32 to vector<1x128xi32>
    %29 = arith.cmpi eq, %16, %28 : vector<1x128xi32>
    %c2_9 = arith.constant 2 : index
    %30 = memref.load %arg0[%c2_9] : memref<3xf32, #tpu.memory_space<smem>>
    %31 = vector.broadcast %30 : f32 to vector<1x128xf32>
    %32 = arith.select %29, %31, %27 : vector<1x128xi1>, vector<1x128xf32>
    %33 = arith.mulf %15, %32 : vector<1x128xf32>
    %cst_10 = arith.constant dense<0.000000e+00> : vector<1xf32>
    %34 = vector.multi_reduction <add>, %33, %cst_10 [1] : vector<1x128xf32> to vector<1xf32>
    %35 = vector.shape_cast %34 : vector<1xf32> to vector<1x1xf32>
    %c0_11 = arith.constant 0 : index
    %36 = memref.load %arg1[%c0_11] : memref<1xf32, #tpu.memory_space<smem>>
    %37 = vector.broadcast %36 : f32 to vector<1x1xf32>
    %38 = arith.addf %35, %37 : vector<1x1xf32>
    %c0_12 = arith.constant 0 : index
    %c0_13 = arith.constant 0 : index
    %39 = vector.load %arg3[%c0_12, %c0_13] : memref<1x1xf32, #tpu.memory_space<vmem>>, vector<1x1xf32>
    tpu.vector_store %arg3[%c0_12, %c0_13], %38 {strides = array<i32>} : memref<1x1xf32, #tpu.memory_space<vmem>>, vector<1x1xf32>,
    return
  }
}

</mosaic_0001>

<bundles_post_ra>
// kernel: forward.1
= control target key start
LH: loop header
LB: loop body
LE: loop exit
PB: predicated region body
PF: predicated region fallthrough
CT: control target
= control target key end

     0   :  { %9 = vsyncpa [#allocation6], 0  ;;  %s216_s0 = inlined_call_operand.hbm [shape: f32[3], index: 0, kind: input, shape index: {}]   ;;  %s217_s1 = inlined_call_operand.<no memory space> [shape: f32[1], index: 1, kind: input, shape index: {}]   ;;  %s218_s2 = inlined_call_operand.hbm [shape: f32[8,128], index: 2, kind: input, shape index: {}]   ;;  %s219_s3 = inlined_call_operand.hbm [shape: f32[1,1], index: 3, kind: output, shape index: {}]  }
   0x1   :  { %10 = vsyncpa [#allocation4], 0 }
   0x2   :  { %11 = vsyncpa [#allocation5], 0  ;;  %s94_s14 = scalar_lea.hbm %s216_s0, 16 }
   0x3   :  { %p95_p0 = scmp.ne.s32.totalorder %s216_s0, %s94_s14  ;;  %p98_p1 = scmp.lt.u32.totalorder %s94_s14, %s216_s0 }
   0x5   :  { %p100_p2 = pnand %p98_p1, %p95_p0 }
   0x7   :  { %103 = shalt.err (!%p100_p2)
}
   0x8   :  { %s154_s19 = smov [#allocation3]   ;;  %s155_s22 = smov [#allocation7]  }
   0x9   :  { %19 = dma.hbm_to_smem %s216_s0, 16, %s154_s19, [#allocation6]  }
   0xa   :  { %s28_s23 = sshll.u32 %s155_s22, 4  ;;  %s104_s26 = scalar_lea.hbm %s218_s2, 128  ;;  %s29_s23 = int_to_ptr.vmem [resolvable:$true] %s28_s23 }
   0xb   :  { %p105_p3 = scmp.ne.s32.totalorder %s218_s2, %s104_s26  ;;  %p108_p4 = scmp.lt.u32.totalorder %s104_s26, %s218_s2 }
   0xd   :  { %p110_p5 = pnand %p108_p4, %p105_p3 }
   0xf   :  { %113 = shalt.err (!%p110_p5)
}
  0x10   :  { %s114_s4 = scalar_lea.vmem %s29_s23, 128  ;;  %p119_p7 = scmp.lt.s32.totalorder %s29_s23, %s29_s23 }
  0x11   :  { %p115_p6 = scmp.ne.s32.totalorder %s29_s23, %s114_s4  ;;  %p120_p8 = scmp.lt.s32.totalorder %s114_s4, %s114_s4 }
  0x13   :  { %p121_p9 = por %p120_p8, %p119_p7 }
  0x15   :  { %p122_p10 = pnand %p121_p9, %p115_p6 }
  0x17   :  { %125 = shalt.err (!%p122_p10)
}
  0x18   :  { %31 = dma.hbm_to_vmem [thread:$0]  %s218_s2, 128, %s29_s23, [#allocation4]  }
  0x19   :  { %148 = dma.done.wait [#allocation6], 16  }
  0x1a   :  { %149 = vsyncadd [#allocation6], 4294967280 }
  0x1b   :  { %150 = dma.done.wait [#allocation4], 128  }
  0x1c   :  { %151 = vsyncadd [#allocation4], 4294967168 }
  0x1d   :  { %38 = sfence }
  0x1e   :  { %s40_s6 = sld [smem:[#allocation3]]  ;;  %v55_v0 = vlaneseq  ;;  %s89_s7 = sld [smem:[#allocation3 + $0x1]]  ;;  %v41_v2 = vld [vmem:[#allocation7] sm:$0x1]  ;;  %v46_v3 = vld [vmem:[#allocation7 + $0x1] sm:$0x1]  ;;  %v69_v20 = vstv %s217_s1 }
  0x1f   :  { %s90_s8 = sld [smem:[#allocation3 + $0x2]]  ;;  %v39_v4 = vld [vmem:[#allocation7 + $0x3] sm:$0x1]  ;;  %v51_v6 = vld [vmem:[#allocation7 + $0x2] sm:$0x1]  ;;  %vm64_vm3 = vcmask 1040384  }
  0x20   :  { %v56_v1 = vand.u32 127, %v55_v0  ;;  %s156_s10 = smov [#allocation8]   ;;  %vm71_vm4 = vcmask 0  }
  0x21   :  { %s79_s11 = sshll.u32 %s156_s10, 4  ;;  %s80_s11 = int_to_ptr.vmem [resolvable:$true] %s79_s11 }
  0x22   :  { %vm57_vm0 = vcmp.eq.s32.totalorder %v56_v1, 0  ;;  %vm59_vm1 = vcmp.eq.s32.totalorder %v56_v1, 1  ;;  %vm61_vm2 = vcmp.eq.s32.totalorder %v56_v1, 2  ;;  %s126_s12 = scalar_lea.vmem %s80_s11, 16  ;;  %s130_s13 = scalar_lea.vmem %s80_s11, 32 }
  0x23   :  { %p127_p11 = scmp.ne.s32.totalorder %s80_s11, %s126_s12  ;;  %p131_p12 = scmp.lt.s32.totalorder %s80_s11, %s80_s11 }
  0x24   :  { %v42_v5 = vstv %s40_s6  ;;  %v47_v8 = vstv %s89_s7  ;;  %p132_p13 = scmp.lt.s32.totalorder %s130_s13, %s126_s12 }
  0x25   :  { %v43_v7 = vmul.f32 %v42_v5, %v41_v2  ;;  %v52_v9 = vstv %s90_s8  ;;  %v58_v10 = vsel %vm57_vm0, %v42_v5, 0.0  ;;  %v48_v11 = vmul.f32 %v47_v8, %v46_v3 }
  0x26   :  { %v53_v13 = vmul.f32 %v52_v9, %v51_v6  ;;  %v60_v14 = vsel %vm59_vm1, %v47_v8, %v58_v10  ;;  %p133_p0 = por %p132_p13, %p131_p12 }
  0x27   :  { %v44_v12 = vadd.f32 %v43_v7, %v39_v4  ;;  %v62_v16 = vsel %vm61_vm2, %v52_v9, %v60_v14 }
  0x28   :  { %p134_p1 = pnand %p133_p0, %p127_p11 }
  0x29   :  { %v49_v15 = vadd.f32 %v48_v11, %v44_v12 }
  0x2b   :  { %v54_v17 = vadd.f32 %v53_v13, %v49_v15 }
  0x2d   :  { %v63_v18 = vmul.f32 %v62_v16, %v54_v17 }
  0x2f   :  { %v65_v19 = vsel %vm64_vm3, %v63_v18, 0.0 }
  0x30   :  { %66 = vadd.xlane.f32.xlu0 %v65_v19 }
  0xbd   :  { %v67_v21 = vpop.xlane.xlu0 %66 }
  0xbe   :  { %v70_v22 = vadd.f32 %v69_v20, %v67_v21 }
  0xc0   :  { %72 = vst.msk [vmem:[#allocation8] sm:$0x1] %vm71_vm4, %v70_v22 }
  0xc1   :  { %137 = shalt.err (!%p134_p1)
}
  0xc2   :  { %s138_s16 = scalar_lea.hbm %s219_s3, 16 }
  0xc3   :  { %p139_p2 = scmp.ne.s32.totalorder %s219_s3, %s138_s16  ;;  %p142_p3 = scmp.lt.u32.totalorder %s138_s16, %s219_s3 }
  0xc5   :  { %p144_p4 = pnand %p142_p3, %p139_p2 }
  0xc7   :  { %147 = shalt.err (!%p144_p4)
}
  0xc8   :  { %82 = dma.vmem_to_hbm [thread:$0]  %s80_s11, 16, %s219_s3, [#allocation5]  }
  0xc9   :  { %152 = dma.done.wait [#allocation5], 16  }
  0xca   :  { %153 = vsyncadd [#allocation5], 4294967280 }
  0xcb   :  { %86 = vsyncpa [#allocation4], 1 }
  0xcc   :  { %87 = vsyncpa [#allocation5], 1 }
  0xcd   :  { %88 = vsyncpa [#allocation6], 1 }

</bundles_post_ra>
